<compile_context>
chip_gen: v6e
topology: v6e:2x2x1
jax: 0.10.0
libtpu: 0.0.40
codegen_flags: <defaults>
</compile_context>

<pallas_src>
import jax
import jax.numpy as jnp
from jax.experimental import pallas as pl
from jax.experimental.pallas import tpu as pltpu

LANE = 128      # vreg lane width: last dims padded to a multiple of this
SUBLANE = 16    # batch rows padded to a multiple of this (covers f32 and bf16)
TM_MAX = 256    # batch-tile rows per grid step for large batches


def _round_up(n, m):
    return ((n + m - 1) // m) * m


def mlp_kernel(x_ref, w1_ref, b1_ref, w2_ref, b2_ref, w3_ref, b3_ref, o_ref):
    # x_ref:  (TM, Fp)      w1_ref: (Fp, Hp)   b1_ref: (1, Hp)  [biases in f32]
    # w2_ref: (Hp, Hp)      b2_ref: (1, Hp)
    # w3_ref: (Hp, Op)      b3_ref: (1, Op)    o_ref:  (TM, Op) f32
    cdt = w1_ref.dtype  # compute dtype fed to the MXU (f32 or bf16)

    h1 = jnp.dot(x_ref[...], w1_ref[...], preferred_element_type=jnp.float32)
    h1 = jnp.maximum(h1 + b1_ref[...], 0.0)           # bias + ReLU in f32

    h2 = jnp.dot(h1.astype(cdt), w2_ref[...], preferred_element_type=jnp.float32)
    h2 = h2 + b2_ref[...]                             # no activation (matches PyTorch)

    out = jnp.dot(h2.astype(cdt), w3_ref[...], preferred_element_type=jnp.float32)
    o_ref[...] = (out + b3_ref[...]).astype(o_ref.dtype)


def prepare_params(params, compute_dtype=jnp.float32):
    """One-time layout work (hoisted out of the forward hot path):
    transpose PyTorch (out, in) weights to (in, out), zero-pad hidden/output
    dims to the 128-lane width, and cast matmul operands to the compute dtype.
    Biases stay in f32 (the bias add / ReLU run in f32 inside the kernel)."""
    w1, b1 = params["w1"], params["b1"]   # (H, F), (H,)
    w2, b2 = params["w2"], params["b2"]   # (H, H), (H,)
    w3, b3 = params["w3"], params["b3"]   # (O, H), (O,)

    F, H, O = w1.shape[1], w1.shape[0], w3.shape[0]
    Fp, Hp, Op = _round_up(F, LANE), _round_up(H, LANE), _round_up(O, LANE)

    def pad2(a, r, c):
        return jnp.pad(a, ((0, r - a.shape[0]), (0, c - a.shape[1])))

    return {
        "w1t": pad2(w1.T, Fp, Hp).astype(compute_dtype),
        "w2t": pad2(w2.T, Hp, Hp).astype(compute_dtype),
        "w3t": pad2(w3.T, Hp, Op).astype(compute_dtype),
        "b1r": jnp.pad(b1, (0, Hp - H))[None, :].astype(jnp.float32),
        "b2r": jnp.pad(b2, (0, Hp - H))[None, :].astype(jnp.float32),
        "b3r": jnp.pad(b3, (0, Op - O))[None, :].astype(jnp.float32),
        "n_features": F,
        "n_outputs": O,
        "compute_dtype": compute_dtype,
    }


def make_forward(prepared):
    w1t, b1r = prepared["w1t"], prepared["b1r"]
    w2t, b2r = prepared["w2t"], prepared["b2r"]
    w3t, b3r = prepared["w3t"], prepared["b3r"]
    Fp, Hp, Op = w1t.shape[0], w1t.shape[1], w3t.shape[1]
    n_features = prepared["n_features"]
    n_outputs = prepared["n_outputs"]
    compute_dtype = prepared["compute_dtype"]

    @jax.jit
    def forward(x_nchw):
        B = x_nchw.shape[0]
        x_flat = x_nchw.reshape(B, -1)                 # nn.Flatten (start_dim=1)
        assert x_flat.shape[1] == n_features

        # Pad batch to full sublane tiles and features to the padded F.
        Bp = _round_up(max(B, SUBLANE), SUBLANE)
        if Bp >= TM_MAX:
            tm = TM_MAX
            Bp = _round_up(Bp, tm)
        else:
            tm = Bp
        nb = Bp // tm

        x_pad = jnp.pad(x_flat.astype(compute_dtype),
                        ((0, Bp - B), (0, Fp - n_features)))

        const = lambda i: (0, 0)   # weights/biases stay resident across batch tiles
        out_pad = pl.pallas_call(
            mlp_kernel,
            out_shape=jax.ShapeDtypeStruct((Bp, Op), jnp.float32),
            grid=(nb,),
            in_specs=[
                pl.BlockSpec((tm, Fp), lambda i: (i, 0)),   # x
                pl.BlockSpec((Fp, Hp), const),              # w1^T
                pl.BlockSpec((1, Hp), const),               # b1
                pl.BlockSpec((Hp, Hp), const),              # w2^T
                pl.BlockSpec((1, Hp), const),               # b2
                pl.BlockSpec((Hp, Op), const),              # w3^T
                pl.BlockSpec((1, Op), const),               # b3
            ],
            out_specs=pl.BlockSpec((tm, Op), lambda i: (i, 0)),
            compiler_params=pltpu.CompilerParams(
                dimension_semantics=("parallel",)),
        )(x_pad, w1t, b1r, w2t, b2r, w3t, b3r)

        return out_pad[:B, :n_outputs]

    return forward


def init_params(key, n_features, n_hidden, n_outputs):
    """Deterministic init mimicking nn.Linear's uniform(-1/sqrt(in), 1/sqrt(in))."""
    ks = jax.random.split(key, 6)

    def lin(kw, kb, fan_in, fan_out):
        bound = 1.0 / jnp.sqrt(fan_in)
        w = jax.random.uniform(kw, (fan_out, fan_in), jnp.float32, -bound, bound)
        b = jax.random.uniform(kb, (fan_out,), jnp.float32, -bound, bound)
        return w, b

    w1, b1 = lin(ks[0], ks[1], n_features, n_hidden)
    w2, b2 = lin(ks[2], ks[3], n_hidden, n_hidden)
    w3, b3 = lin(ks[4], ks[5], n_hidden, n_outputs)
    return {"w1": w1, "b1": b1, "w2": w2, "b2": b2, "w3": w3, "b3": b3}


def reference_forward(x_nchw, p):
    x = x_nchw.reshape(x_nchw.shape[0], -1)
    h1 = jnp.maximum(x @ p["w1"].T + p["b1"], 0.0)
    h2 = h1 @ p["w2"].T + p["b2"]
    return h2 @ p["w3"].T + p["b3"]


if __name__ == "__main__":
    key = jax.random.PRNGKey(0)
    k_x, k_p = jax.random.split(key)

    # Small shapes consistent with the module: batch=2, channels=4, 16x16 spatial.
    B, C, H, W = 2, 4, 16, 16
    n_features = C * H * W            # 1024
    n_hidden = 32
    n_outputs = 8

    x = jax.random.normal(k_x, (B, C, H, W), dtype=jnp.float32)
    params = init_params(k_p, n_features, n_hidden, n_outputs)
    ref = reference_forward(x, params)

    # --- f32 path: exact-semantics check -----------------------------------
    fwd_f32 = make_forward(prepare_params(params, compute_dtype=jnp.float32))
    out_f32 = jax.block_until_ready(fwd_f32(x))
    assert out_f32.shape == (B, n_outputs), out_f32.shape
    assert jnp.allclose(out_f32, ref, atol=5e-3, rtol=5e-3), "f32 mismatch vs reference"

    # --- bf16 path: halves DMA bytes, feeds the bf16 MXU on v6e/v7x ---------
    fwd_bf16 = make_forward(prepare_params(params, compute_dtype=jnp.bfloat16))
    out_bf16 = jax.block_until_ready(fwd_bf16(x))
    assert out_bf16.shape == (B, n_outputs), out_bf16.shape
    assert jnp.allclose(out_bf16, ref, atol=5e-2, rtol=5e-2), "bf16 mismatch vs reference"

    print("KERNEL_OK")
</pallas_src>

<mosaic_0001>
module attributes {stable_mosaic.version = 11 : i64} {
  func.func @mlp_kernel(%arg0: i32, %arg1: memref<16x1024xf32, #tpu.memory_space<vmem>>, %arg2: memref<1024x128xf32, #tpu.memory_space<vmem>>, %arg3: memref<1x128xf32, #tpu.memory_space<vmem>>, %arg4: memref<128x128xf32, #tpu.memory_space<vmem>>, %arg5: memref<1x128xf32, #tpu.memory_space<vmem>>, %arg6: memref<128x128xf32, #tpu.memory_space<vmem>>, %arg7: memref<1x128xf32, #tpu.memory_space<vmem>>, %arg8: memref<16x128xf32, #tpu.memory_space<vmem>>) attributes {dimension_semantics = [#tpu.dimension_semantics<parallel>], iteration_bounds = array<i64: 1>, scalar_prefetch = 0 : i64, scratch_operands = 0 : i64, tpu.core_type = #tpu.core_type<tc>, window_params = [{transform_indices = @transform_0, window_bounds = array<i64: 16, 1024>}, {pipeline_mode = #tpu.pipeline_mode<synchronous>, transform_indices = @transform_1, window_bounds = array<i64: 1024, 128>}, {pipeline_mode = #tpu.pipeline_mode<synchronous>, transform_indices = @transform_2, window_bounds = array<i64: 1, 128>}, {pipeline_mode = #tpu.pipeline_mode<synchronous>, transform_indices = @transform_3, window_bounds = array<i64: 128, 128>}, {pipeline_mode = #tpu.pipeline_mode<synchronous>, transform_indices = @transform_4, window_bounds = array<i64: 1, 128>}, {pipeline_mode = #tpu.pipeline_mode<synchronous>, transform_indices = @transform_5, window_bounds = array<i64: 128, 128>}, {pipeline_mode = #tpu.pipeline_mode<synchronous>, transform_indices = @transform_6, window_bounds = array<i64: 1, 128>}, {transform_indices = @transform_7, window_bounds = array<i64: 16, 128>}]} {
    %c0 = arith.constant 0 : index
    %c0_0 = arith.constant 0 : index
    %0 = vector.load %arg1[%c0, %c0_0] : memref<16x1024xf32, #tpu.memory_space<vmem>>, vector<16x1024xf32>
    %c0_1 = arith.constant 0 : index
    %c0_2 = arith.constant 0 : index
    %1 = vector.load %arg2[%c0_1, %c0_2] : memref<1024x128xf32, #tpu.memory_space<vmem>>, vector<1024x128xf32>
    %cst = arith.constant dense<0.000000e+00> : vector<16x128xf32>
    %2 = tpu.matmul %0, %1, %cst {dimension_numbers = #tpu.dot_dimension_numbers<[1], [0], [0], [1], [0, 0, 1, 1], [], []>} : vector<16x1024xf32>, vector<1024x128xf32>, vector<16x128xf32> -> vector<16x128xf32>
    %c0_3 = arith.constant 0 : index
    %c0_4 = arith.constant 0 : index
    %3 = vector.load %arg3[%c0_3, %c0_4] : memref<1x128xf32, #tpu.memory_space<vmem>>, vector<1x128xf32>
    %4 = vector.broadcast %3 : vector<1x128xf32> to vector<16x128xf32>
    %5 = arith.addf %2, %4 : vector<16x128xf32>
    %cst_5 = arith.constant 0.000000e+00 : f32
    %6 = vector.broadcast %cst_5 : f32 to vector<16x128xf32>
    %7 = arith.maximumf %5, %6 : vector<16x128xf32>
    %c0_6 = arith.constant 0 : index
    %c0_7 = arith.constant 0 : index
    %8 = vector.load %arg4[%c0_6, %c0_7] : memref<128x128xf32, #tpu.memory_space<vmem>>, vector<128x128xf32>
    %cst_8 = arith.constant dense<0.000000e+00> : vector<16x128xf32>
    %9 = tpu.matmul %7, %8, %cst_8 {dimension_numbers = #tpu.dot_dimension_numbers<[1], [0], [0], [1], [0, 0, 1, 1], [], []>} : vector<16x128xf32>, vector<128x128xf32>, vector<16x128xf32> -> vector<16x128xf32>
    %c0_9 = arith.constant 0 : index
    %c0_10 = arith.constant 0 : index
    %10 = vector.load %arg5[%c0_9, %c0_10] : memref<1x128xf32, #tpu.memory_space<vmem>>, vector<1x128xf32>
    %11 = vector.broadcast %10 : vector<1x128xf32> to vector<16x128xf32>
    %12 = arith.addf %9, %11 : vector<16x128xf32>
    %c0_11 = arith.constant 0 : index
    %c0_12 = arith.constant 0 : index
    %13 = vector.load %arg6[%c0_11, %c0_12] : memref<128x128xf32, #tpu.memory_space<vmem>>, vector<128x128xf32>
    %cst_13 = arith.constant dense<0.000000e+00> : vector<16x128xf32>
    %14 = tpu.matmul %12, %13, %cst_13 {dimension_numbers = #tpu.dot_dimension_numbers<[1], [0], [0], [1], [0, 0, 1, 1], [], []>} : vector<16x128xf32>, vector<128x128xf32>, vector<16x128xf32> -> vector<16x128xf32>
    %c0_14 = arith.constant 0 : index
    %c0_15 = arith.constant 0 : index
    %15 = vector.load %arg7[%c0_14, %c0_15] : memref<1x128xf32, #tpu.memory_space<vmem>>, vector<1x128xf32>
    %16 = vector.broadcast %15 : vector<1x128xf32> to vector<16x128xf32>
    %17 = arith.addf %14, %16 : vector<16x128xf32>
    %c0_16 = arith.constant 0 : index
    %c0_17 = arith.constant 0 : index
    %18 = vector.load %arg8[%c0_16, %c0_17] : memref<16x128xf32, #tpu.memory_space<vmem>>, vector<16x128xf32>
    tpu.vector_store %arg8[%c0_16, %c0_17], %17 {strides = array<i32>} : memref<16x128xf32, #tpu.memory_space<vmem>>, vector<16x128xf32>,
    return
  }
  func.func @transform_0(%arg0: i32) -> (i32, i32) {
    %c0_i32 = arith.constant 0 : i32
    %c0_i32_0 = arith.constant 0 : i32
    return %arg0, %c0_i32 : i32, i32
  }
  func.func @transform_1(%arg0: i32) -> (i32, i32) {
    %c0_i32 = arith.constant 0 : i32
    %c0_i32_0 = arith.constant 0 : i32
    %c0_i32_1 = arith.constant 0 : i32
    return %c0_i32, %c0_i32_0 : i32, i32
  }
  func.func @transform_2(%arg0: i32) -> (i32, i32) {
    %c0_i32 = arith.constant 0 : i32
    %c0_i32_0 = arith.constant 0 : i32
    %c0_i32_1 = arith.constant 0 : i32
    return %c0_i32, %c0_i32_0 : i32, i32
  }
  func.func @transform_3(%arg0: i32) -> (i32, i32) {
    %c0_i32 = arith.constant 0 : i32
    %c0_i32_0 = arith.constant 0 : i32
    %c0_i32_1 = arith.constant 0 : i32
    return %c0_i32, %c0_i32_0 : i32, i32
  }
  func.func @transform_4(%arg0: i32) -> (i32, i32) {
    %c0_i32 = arith.constant 0 : i32
    %c0_i32_0 = arith.constant 0 : i32
    %c0_i32_1 = arith.constant 0 : i32
    return %c0_i32, %c0_i32_0 : i32, i32
  }
  func.func @transform_5(%arg0: i32) -> (i32, i32) {
    %c0_i32 = arith.constant 0 : i32
    %c0_i32_0 = arith.constant 0 : i32
    %c0_i32_1 = arith.constant 0 : i32
    return %c0_i32, %c0_i32_0 : i32, i32
  }
  func.func @transform_6(%arg0: i32) -> (i32, i32) {
    %c0_i32 = arith.constant 0 : i32
    %c0_i32_0 = arith.constant 0 : i32
    %c0_i32_1 = arith.constant 0 : i32
    return %c0_i32, %c0_i32_0 : i32, i32
  }
  func.func @transform_7(%arg0: i32) -> (i32, i32) {
    %c0_i32 = arith.constant 0 : i32
    %c0_i32_0 = arith.constant 0 : i32
    return %arg0, %c0_i32 : i32, i32
  }
}

</mosaic_0001>

<bundles_post_ra>
// kernel: forward.1
= control target key start
LH: loop header
LB: loop body
LE: loop exit
PB: predicated region body
PF: predicated region fallthrough
CT: control target
= control target key end

     0   :  { %12 = vsyncpa [#allocation3], 0  ;;  %s982_s24 = smov [#allocation2]   ;;  %s1187_s0 = inlined_call_operand.vmem [shape: f32[16,1024], index: 0, kind: input, shape index: {}]   ;;  %s1188_s1 = inlined_call_operand.hbm [shape: f32[1024,128], index: 1, kind: input, shape index: {}]   ;;  %s1189_s2 = inlined_call_operand.vmem [shape: f32[1,128], index: 2, kind: input, shape index: {}]   ;;  %s1190_s3 = inlined_call_operand.vmem [shape: f32[128,128], index: 3, kind: input, shape index: {}]   ;;  %s1191_s4 = inlined_call_operand.vmem [shape: f32[1,128], index: 4, kind: input, shape index: {}]   ;;  %s1192_s5 = inlined_call_operand.vmem [shape: f32[128,128], index: 5, kind: input, shape index: {}]   ;;  %s1193_s6 = inlined_call_operand.vmem [shape: f32[1,128], index: 6, kind: input, shape index: {}]   ;;  %s1194_s7 = inlined_call_operand.vmem [shape: f32[16,128], index: 7, kind: output, shape index: {}]  }
   0x1   :  { %s20_s25 = sshll.u32 %s982_s24, 4  ;;  %s21_s25 = int_to_ptr.vmem [resolvable:$true] %s20_s25 }
   0x2   :  { %s968_s26 = scalar_lea.vmem %s21_s25, 16384  ;;  %p973_p1 = scmp.lt.s32.totalorder %s21_s25, %s21_s25 }
   0x3   :  { %p969_p0 = scmp.ne.s32.totalorder %s21_s25, %s968_s26  ;;  %p974_p2 = scmp.lt.s32.totalorder %s968_s26, %s968_s26 }
   0x5   :  { %p975_p3 = por %p974_p2, %p973_p1 }
   0x7   :  { %p976_p4 = pnand %p975_p3, %p969_p0 }
   0x9   :  { %979 = shalt.err (!%p976_p4)
}
   0xa   :  { %s983_s27 = smov 128   ;;  %s984_s28 = smov 8  }
   0xb   :  { %26 = dma.hbm_to_vmem [thread:$0]  %s1188_s1, 16384, %s21_s25, [#allocation3], %s983_s27, %s983_s27, %s984_s28  }
   0xc   :  { %980 = dma.done.wait [#allocation3], 16384  }
   0xd   :  { %981 = vsyncadd [#allocation3], 4294950912  ;;  %v87_v0 = vld [vmem:[#allocation2 + $0xf8] sm:$0xff]  ;;  %v86_v4 = vld [vmem:[#allocation2 + $0xf0] sm:$0xff] }
   0xe   :  { %v119_v1 = vld [vmem:[#allocation2 + $0x1f8] sm:$0xff]  ;;  %699 = vmatprep.subr.mxu0 %v87_v0  ;;  %v118_v5 = vld [vmem:[#allocation2 + $0x1f0] sm:$0xff]  ;;  %v85_v8 = vld [vmem:[#allocation2 + $0xe8] sm:$0xff] }
   0xf   :  { %v71_v2 = vld [vmem:[#allocation2 + $0x78] sm:$0xff]  ;;  %737 = vmatprep.subr.mxu1 %v119_v1  ;;  %v70_v6 = vld [vmem:[#allocation2 + $0x70] sm:$0xff]  ;;  %v117_v9 = vld [vmem:[#allocation2 + $0x1e8] sm:$0xff] }
  0x10   :  { %v103_v3 = vld [vmem:[#allocation2 + $0x178] sm:$0xff]  ;;  %700 = vmatpush3.msra.mxu0 %v71_v2  ;;  %v102_v7 = vld [vmem:[#allocation2 + $0x170] sm:$0xff]  ;;  %v69_v10 = vld [vmem:[#allocation2 + $0x68] sm:$0xff] }
  0x11   :  { %738 = vmatpush3.msra.mxu1 %v103_v3  ;;  %701 = vmatprep.subr.mxu0 %v86_v4  ;;  %v101_v11 = vld [vmem:[#allocation2 + $0x168] sm:$0xff]  ;;  %v84_v12 = vld [vmem:[#allocation2 + $0xe0] sm:$0xff]  ;;  %v83_v16 = vld [vmem:[#allocation2 + $0xd8] sm:$0xff] }
  0x12   :  { %739 = vmatprep.subr.mxu1 %v118_v5  ;;  %702 = vmatpush3.msra.mxu0 %v70_v6  ;;  %v116_v13 = vld [vmem:[#allocation2 + $0x1e0] sm:$0xff]  ;;  %v115_v17 = vld [vmem:[#allocation2 + $0x1d8] sm:$0xff]  ;;  %v82_v20 = vld [vmem:[#allocation2 + $0xd0] sm:$0xff] }
  0x13   :  { %740 = vmatpush3.msra.mxu1 %v102_v7  ;;  %703 = vmatprep.subr.mxu0 %v85_v8  ;;  %v68_v14 = vld [vmem:[#allocation2 + $0x60] sm:$0xff]  ;;  %v67_v18 = vld [vmem:[#allocation2 + $0x58] sm:$0xff]  ;;  %v114_v21 = vld [vmem:[#allocation2 + $0x1d0] sm:$0xff] }
  0x14   :  { %741 = vmatprep.subr.mxu1 %v117_v9  ;;  %v100_v15 = vld [vmem:[#allocation2 + $0x160] sm:$0xff]  ;;  %704 = vmatpush3.msra.mxu0 %v69_v10  ;;  %v99_v19 = vld [vmem:[#allocation2 + $0x158] sm:$0xff]  ;;  %v66_v22 = vld [vmem:[#allocation2 + $0x50] sm:$0xff] }
  0x15   :  { %742 = vmatpush3.msra.mxu1 %v101_v11  ;;  %705 = vmatprep.subr.mxu0 %v84_v12  ;;  %v98_v23 = vld [vmem:[#allocation2 + $0x150] sm:$0xff]  ;;  %v81_v24 = vld [vmem:[#allocation2 + $0xc8] sm:$0xff]  ;;  %v80_v28 = vld [vmem:[#allocation2 + $0xc0] sm:$0xff] }
  0x16   :  { %743 = vmatprep.subr.mxu1 %v116_v13  ;;  %706 = vmatpush3.msra.mxu0 %v68_v14  ;;  %v113_v25 = vld [vmem:[#allocation2 + $0x1c8] sm:$0xff]  ;;  %v112_v29 = vld [vmem:[#allocation2 + $0x1c0] sm:$0xff]  ;;  %v79_v32 = vld [vmem:[#allocation2 + $0xb8] sm:$0xff] }
  0x17   :  { %744 = vmatpush3.msra.mxu1 %v100_v15  ;;  %707 = vmatprep.subr.mxu0 %v83_v16  ;;  %v65_v26 = vld [vmem:[#allocation2 + $0x48] sm:$0xff]  ;;  %v64_v30 = vld [vmem:[#allocation2 + $0x40] sm:$0xff]  ;;  %v111_v33 = vld [vmem:[#allocation2 + $0x1b8] sm:$0xff] }
  0x18   :  { %745 = vmatprep.subr.mxu1 %v115_v17  ;;  %708 = vmatpush3.msra.mxu0 %v67_v18  ;;  %v97_v27 = vld [vmem:[#allocation2 + $0x148] sm:$0xff]  ;;  %v96_v31 = vld [vmem:[#allocation2 + $0x140] sm:$0xff]  ;;  %v63_v34 = vld [vmem:[#allocation2 + $0x38] sm:$0xff] }
  0x19   :  { %746 = vmatpush3.msra.mxu1 %v99_v19  ;;  %709 = vmatprep.subr.mxu0 %v82_v20  ;;  %v95_v35 = vld [vmem:[#allocation2 + $0x138] sm:$0xff]  ;;  %v78_v36 = vld [vmem:[#allocation2 + $0xb0] sm:$0xff]  ;;  %v77_v40 = vld [vmem:[#allocation2 + $0xa8] sm:$0xff] }
  0x1a   :  { %747 = vmatprep.subr.mxu1 %v114_v21  ;;  %710 = vmatpush3.msra.mxu0 %v66_v22  ;;  %v110_v37 = vld [vmem:[#allocation2 + $0x1b0] sm:$0xff]  ;;  %v109_v41 = vld [vmem:[#allocation2 + $0x1a8] sm:$0xff]  ;;  %v76_v44 = vld [vmem:[#allocation2 + $0xa0] sm:$0xff] }
  0x1b   :  { %748 = vmatpush3.msra.mxu1 %v98_v23  ;;  %711 = vmatprep.subr.mxu0 %v81_v24  ;;  %v62_v38 = vld [vmem:[#allocation2 + $0x30] sm:$0xff]  ;;  %v61_v42 = vld [vmem:[#allocation2 + $0x28] sm:$0xff]  ;;  %v108_v45 = vld [vmem:[#allocation2 + $0x1a0] sm:$0xff] }
  0x1c   :  { %749 = vmatprep.subr.mxu1 %v113_v25  ;;  %712 = vmatpush3.msra.mxu0 %v65_v26  ;;  %v94_v39 = vld [vmem:[#allocation2 + $0x130] sm:$0xff]  ;;  %v93_v43 = vld [vmem:[#allocation2 + $0x128] sm:$0xff]  ;;  %v60_v46 = vld [vmem:[#allocation2 + $0x20] sm:$0xff] }
  0x1d   :  { %750 = vmatpush3.msra.mxu1 %v97_v27  ;;  %713 = vmatprep.subr.mxu0 %v80_v28  ;;  %v92_v47 = vld [vmem:[#allocation2 + $0x120] sm:$0xff]  ;;  %v75_v48 = vld [vmem:[#allocation2 + $0x98] sm:$0xff]  ;;  %v74_v52 = vld [vmem:[#allocation2 + $0x90] sm:$0xff] }
  0x1e   :  { %751 = vmatprep.subr.mxu1 %v112_v29  ;;  %714 = vmatpush3.msra.mxu0 %v64_v30  ;;  %v107_v49 = vld [vmem:[#allocation2 + $0x198] sm:$0xff]  ;;  %v106_v53 = vld [vmem:[#allocation2 + $0x190] sm:$0xff]  ;;  %v73_v56 = vld [vmem:[#allocation2 + $0x88] sm:$0xff] }
  0x1f   :  { %752 = vmatpush3.msra.mxu1 %v96_v31  ;;  %715 = vmatprep.subr.mxu0 %v79_v32  ;;  %v59_v50 = vld [vmem:[#allocation2 + $0x18] sm:$0xff]  ;;  %v58_v54 = vld [vmem:[#allocation2 + $0x10] sm:$0xff]  ;;  %v105_v57 = vld [vmem:[#allocation2 + $0x188] sm:$0xff] }
  0x20   :  { %753 = vmatprep.subr.mxu1 %v111_v33  ;;  %716 = vmatpush3.msra.mxu0 %v63_v34  ;;  %v91_v51 = vld [vmem:[#allocation2 + $0x118] sm:$0xff]  ;;  %v90_v55 = vld [vmem:[#allocation2 + $0x110] sm:$0xff]  ;;  %v57_v58 = vld [vmem:[#allocation2 + $0x8] sm:$0xff] }
  0x21   :  { %754 = vmatpush3.msra.mxu1 %v95_v35  ;;  %717 = vmatprep.subr.mxu0 %v78_v36  ;;  %v89_v59 = vld [vmem:[#allocation2 + $0x108] sm:$0xff]  ;;  %v72_v60 = vld [vmem:[#allocation2 + $0x80] sm:$0xff]  ;;  %v43_v2 = vld [vmem:[%s1187_s0 + $0x18] sm:$0xff] }
  0x22   :  { %755 = vmatprep.subr.mxu1 %v110_v37  ;;  %718 = vmatpush3.msra.mxu0 %v62_v38  ;;  %v104_v61 = vld [vmem:[#allocation2 + $0x180] sm:$0xff]  ;;  %v41_v63 = vld [vmem:[%s1187_s0 + $0x8] sm:$0xff]  ;;  %v151_v3 = vld [vmem:[#allocation2 + $0x2f8] sm:$0xff] }
  0x23   :  { %756 = vmatpush3.msra.mxu1 %v94_v39  ;;  %719 = vmatprep.subr.mxu0 %v77_v40  ;;  %v56_v62 = vld [vmem:[#allocation2] sm:$0xff]  ;;  %v183_v4 = vld [vmem:[#allocation2 + $0x3f8] sm:$0xff]  ;;  %v42_v5 = vld [vmem:[%s1187_s0 + $0x10] sm:$0xff] }
  0x24   :  { %757 = vmatprep.subr.mxu1 %v109_v41  ;;  %720 = vmatpush3.msra.mxu0 %v61_v42  ;;  %v88_v0 = vld [vmem:[#allocation2 + $0x100] sm:$0xff]  ;;  %v135_v6 = vld [vmem:[#allocation2 + $0x278] sm:$0xff]  ;;  %v150_v8 = vld [vmem:[#allocation2 + $0x2f0] sm:$0xff] }
  0x25   :  { %758 = vmatpush3.msra.mxu1 %v93_v43  ;;  %721 = vmatprep.subr.mxu0 %v76_v44  ;;  %v40_v1 = vld [vmem:[%s1187_s0] sm:$0xff]  ;;  %v167_v7 = vld [vmem:[#allocation2 + $0x378] sm:$0xff]  ;;  %v182_v9 = vld [vmem:[#allocation2 + $0x3f0] sm:$0xff] }
  0x26   :  { %759 = vmatprep.subr.mxu1 %v108_v45  ;;  %722 = vmatpush3.msra.mxu0 %v60_v46  ;;  %v134_v10 = vld [vmem:[#allocation2 + $0x270] sm:$0xff]  ;;  %v149_v12 = vld [vmem:[#allocation2 + $0x2e8] sm:$0xff]  ;;  %v148_v16 = vld [vmem:[#allocation2 + $0x2e0] sm:$0xff] }
  0x27   :  { %760 = vmatpush3.msra.mxu1 %v92_v47  ;;  %723 = vmatprep.subr.mxu0 %v75_v48  ;;  %v166_v11 = vld [vmem:[#allocation2 + $0x370] sm:$0xff]  ;;  %v181_v13 = vld [vmem:[#allocation2 + $0x3e8] sm:$0xff]  ;;  %v180_v17 = vld [vmem:[#allocation2 + $0x3e0] sm:$0xff] }
  0x28   :  { %761 = vmatprep.subr.mxu1 %v107_v49  ;;  %724 = vmatpush3.msra.mxu0 %v59_v50  ;;  %v133_v14 = vld [vmem:[#allocation2 + $0x268] sm:$0xff]  ;;  %v132_v18 = vld [vmem:[#allocation2 + $0x260] sm:$0xff]  ;;  %v147_v20 = vld [vmem:[#allocation2 + $0x2d8] sm:$0xff] }
  0x29   :  { %762 = vmatpush3.msra.mxu1 %v91_v51  ;;  %725 = vmatprep.subr.mxu0 %v74_v52  ;;  %v165_v15 = vld [vmem:[#allocation2 + $0x368] sm:$0xff]  ;;  %v164_v19 = vld [vmem:[#allocation2 + $0x360] sm:$0xff]  ;;  %v179_v21 = vld [vmem:[#allocation2 + $0x3d8] sm:$0xff] }
  0x2a   :  { %763 = vmatprep.subr.mxu1 %v106_v53  ;;  %726 = vmatpush3.msra.mxu0 %v58_v54  ;;  %v131_v22 = vld [vmem:[#allocation2 + $0x258] sm:$0xff]  ;;  %v146_v24 = vld [vmem:[#allocation2 + $0x2d0] sm:$0xff]  ;;  %v145_v28 = vld [vmem:[#allocation2 + $0x2c8] sm:$0xff] }
  0x2b   :  { %764 = vmatpush3.msra.mxu1 %v90_v55  ;;  %727 = vmatprep.subr.mxu0 %v73_v56  ;;  %v163_v23 = vld [vmem:[#allocation2 + $0x358] sm:$0xff]  ;;  %v178_v25 = vld [vmem:[#allocation2 + $0x3d0] sm:$0xff]  ;;  %v177_v29 = vld [vmem:[#allocation2 + $0x3c8] sm:$0xff] }
  0x2c   :  { %765 = vmatprep.subr.mxu1 %v105_v57  ;;  %728 = vmatpush3.msra.mxu0 %v57_v58  ;;  %v130_v26 = vld [vmem:[#allocation2 + $0x250] sm:$0xff]  ;;  %v129_v30 = vld [vmem:[#allocation2 + $0x248] sm:$0xff]  ;;  %v144_v32 = vld [vmem:[#allocation2 + $0x2c0] sm:$0xff] }
  0x2d   :  { %766 = vmatpush3.msra.mxu1 %v89_v59  ;;  %729 = vmatprep.subr.mxu0 %v72_v60  ;;  %v162_v27 = vld [vmem:[#allocation2 + $0x350] sm:$0xff]  ;;  %v161_v31 = vld [vmem:[#allocation2 + $0x348] sm:$0xff]  ;;  %v176_v33 = vld [vmem:[#allocation2 + $0x3c0] sm:$0xff] }
  0x2e   :  { %767 = vmatprep.subr.mxu1 %v104_v61  ;;  %730 = vmatpush3.msra.mxu0 %v56_v62  ;;  %v128_v34 = vld [vmem:[#allocation2 + $0x240] sm:$0xff]  ;;  %v143_v36 = vld [vmem:[#allocation2 + $0x2b8] sm:$0xff]  ;;  %v142_v40 = vld [vmem:[#allocation2 + $0x2b0] sm:$0xff] }
  0x2f   :  { %255 = vmatprep.mubr.f32.mxu0 %v41_v63  ;;  %768 = vmatpush3.msra.mxu1 %v88_v0  ;;  %v160_v35 = vld [vmem:[#allocation2 + $0x340] sm:$0xff]  ;;  %v175_v37 = vld [vmem:[#allocation2 + $0x3b8] sm:$0xff]  ;;  %v174_v41 = vld [vmem:[#allocation2 + $0x3b0] sm:$0xff] }
  0x30   :  { %256 = vmatmul.mubr.f32.vlgmr.msra.gmra.mxu0 %v40_v1  ;;  %330 = vmatprep.mubr.f32.mxu1 %v43_v2  ;;  %v127_v38 = vld [vmem:[#allocation2 + $0x238] sm:$0xff]  ;;  %v126_v42 = vld [vmem:[#allocation2 + $0x230] sm:$0xff]  ;;  %v141_v44 = vld [vmem:[#allocation2 + $0x2a8] sm:$0xff] }
  0x31   :  { %775 = vmatprep.subr.mxu0 %v151_v3  ;;  %813 = vmatprep.subr.mxu1 %v183_v4  ;;  %v159_v39 = vld [vmem:[#allocation2 + $0x338] sm:$0xff]  ;;  %v158_v43 = vld [vmem:[#allocation2 + $0x330] sm:$0xff]  ;;  %v173_v45 = vld [vmem:[#allocation2 + $0x3a8] sm:$0xff] }
  0x32   :  { %331 = vmatmul.mubr.f32.vlgmr.msra.gmra.mxu1 %v42_v5  ;;  %776 = vmatpush3.msra.mxu0 %v135_v6  ;;  %v125_v46 = vld [vmem:[#allocation2 + $0x228] sm:$0xff]  ;;  %v140_v48 = vld [vmem:[#allocation2 + $0x2a0] sm:$0xff]  ;;  %v139_v52 = vld [vmem:[#allocation2 + $0x298] sm:$0xff] }
  0x33   :  { %814 = vmatpush3.msra.mxu1 %v167_v7  ;;  %777 = vmatprep.subr.mxu0 %v150_v8  ;;  %v157_v47 = vld [vmem:[#allocation2 + $0x328] sm:$0xff]  ;;  %v172_v49 = vld [vmem:[#allocation2 + $0x3a0] sm:$0xff]  ;;  %v171_v53 = vld [vmem:[#allocation2 + $0x398] sm:$0xff] }
  0x34   :  { %815 = vmatprep.subr.mxu1 %v182_v9  ;;  %778 = vmatpush3.msra.mxu0 %v134_v10  ;;  %v124_v50 = vld [vmem:[#allocation2 + $0x220] sm:$0xff]  ;;  %v49_v54 = vld [vmem:[%s1187_s0 + $0x48] sm:$0xff]  ;;  %v123_v55 = vld [vmem:[#allocation2 + $0x218] sm:$0xff] }
  0x35   :  { %816 = vmatpush3.msra.mxu1 %v166_v11  ;;  %779 = vmatprep.subr.mxu0 %v149_v12  ;;  %v156_v51 = vld [vmem:[#allocation2 + $0x320] sm:$0xff]  ;;  %v155_v56 = vld [vmem:[#allocation2 + $0x318] sm:$0xff]  ;;  %v138_v58 = vld [vmem:[#allocation2 + $0x290] sm:$0xff] }
  0x36   :  { %817 = vmatprep.subr.mxu1 %v181_v13  ;;  %780 = vmatpush3.msra.mxu0 %v133_v14  ;;  %v48_v57 = vld [vmem:[%s1187_s0 + $0x40] sm:$0xff]  ;;  %v170_v59 = vld [vmem:[#allocation2 + $0x390] sm:$0xff]  ;;  %v51_v60 = vld [vmem:[%s1187_s0 + $0x58] sm:$0xff] }
  0x37   :  { %818 = vmatpush3.msra.mxu1 %v165_v15  ;;  %781 = vmatprep.subr.mxu0 %v148_v16  ;;  %v122_v61 = vld [vmem:[#allocation2 + $0x210] sm:$0xff]  ;;  %v137_v63 = vld [vmem:[#allocation2 + $0x288] sm:$0xff]  ;;  %v136_v4 = vld [vmem:[#allocation2 + $0x280] sm:$0xff] }
  0x38   :  { %819 = vmatprep.subr.mxu1 %v180_v17  ;;  %782 = vmatpush3.msra.mxu0 %v132_v18  ;;  %v154_v62 = vld [vmem:[#allocation2 + $0x310] sm:$0xff]  ;;  %v169_v1 = vld [vmem:[#allocation2 + $0x388] sm:$0xff]  ;;  %v168_v5 = vld [vmem:[#allocation2 + $0x380] sm:$0xff] }
  0x39   :  { %820 = vmatpush3.msra.mxu1 %v164_v19  ;;  %783 = vmatprep.subr.mxu0 %v147_v20  ;;  %v50_v0 = vld [vmem:[%s1187_s0 + $0x50] sm:$0xff]  ;;  %v121_v2 = vld [vmem:[#allocation2 + $0x208] sm:$0xff]  ;;  %v120_v6 = vld [vmem:[#allocation2 + $0x200] sm:$0xff] }
  0x3a   :  { %821 = vmatprep.subr.mxu1 %v179_v21  ;;  %784 = vmatpush3.msra.mxu0 %v131_v22  ;;  %v153_v3 = vld [vmem:[#allocation2 + $0x308] sm:$0xff]  ;;  %v152_v8 = vld [vmem:[#allocation2 + $0x300] sm:$0xff]  ;;  %v47_v9 = vld [vmem:[%s1187_s0 + $0x38] sm:$0xff] }
  0x3b   :  { %822 = vmatpush3.msra.mxu1 %v163_v23  ;;  %785 = vmatprep.subr.mxu0 %v146_v24  ;;  %v45_v7 = vld [vmem:[%s1187_s0 + $0x28] sm:$0xff]  ;;  %v44_v10 = vld [vmem:[%s1187_s0 + $0x20] sm:$0xff]  ;;  %v46_v11 = vld [vmem:[%s1187_s0 + $0x30] sm:$0xff] }
  0x3c   :  { %823 = vmatprep.subr.mxu1 %v178_v25  ;;  %786 = vmatpush3.msra.mxu0 %v130_v26  ;;  %v53_v12 = vld [vmem:[%s1187_s0 + $0x68] sm:$0xff]  ;;  %v55_v13 = vld [vmem:[%s1187_s0 + $0x78] sm:$0xff]  ;;  %v52_v14 = vld [vmem:[%s1187_s0 + $0x60] sm:$0xff] }
  0x3d   :  { %824 = vmatpush3.msra.mxu1 %v162_v27  ;;  %787 = vmatprep.subr.mxu0 %v145_v28  ;;  %v54_v15 = vld [vmem:[%s1187_s0 + $0x70] sm:$0xff]  ;;  %v508_v16 = vld [vmem:[%s1190_s3 + $0x78] sm:$0xff]  ;;  %v506_v18 = vld [vmem:[%s1190_s3 + $0x68] sm:$0xff] }
  0x3e   :  { %825 = vmatprep.subr.mxu1 %v177_v29  ;;  %788 = vmatpush3.msra.mxu0 %v129_v30  ;;  %v507_v17 = vld [vmem:[%s1190_s3 + $0x70] sm:$0xff]  ;;  %v505_v19 = vld [vmem:[%s1190_s3 + $0x60] sm:$0xff]  ;;  %v504_v20 = vld [vmem:[%s1190_s3 + $0x58] sm:$0xff] }
  0x3f   :  { %826 = vmatpush3.msra.mxu1 %v161_v31  ;;  %789 = vmatprep.subr.mxu0 %v144_v32  ;;  %v503_v21 = vld [vmem:[%s1190_s3 + $0x50] sm:$0xff]  ;;  %v502_v22 = vld [vmem:[%s1190_s3 + $0x48] sm:$0xff]  ;;  %v501_v23 = vld [vmem:[%s1190_s3 + $0x40] sm:$0xff] }
  0x40   :  { %827 = vmatprep.subr.mxu1 %v176_v33  ;;  %790 = vmatpush3.msra.mxu0 %v128_v34  ;;  %v500_v24 = vld [vmem:[%s1190_s3 + $0x38] sm:$0xff]  ;;  %v499_v25 = vld [vmem:[%s1190_s3 + $0x30] sm:$0xff]  ;;  %v498_v26 = vld [vmem:[%s1190_s3 + $0x28] sm:$0xff] }
  0x41   :  { %828 = vmatpush3.msra.mxu1 %v160_v35  ;;  %791 = vmatprep.subr.mxu0 %v143_v36  ;;  %v497_v27 = vld [vmem:[%s1190_s3 + $0x20] sm:$0xff]  ;;  %v496_v28 = vld [vmem:[%s1190_s3 + $0x18] sm:$0xff]  ;;  %v495_v29 = vld [vmem:[%s1190_s3 + $0x10] sm:$0xff] }
  0x42   :  { %829 = vmatprep.subr.mxu1 %v175_v37  ;;  %792 = vmatpush3.msra.mxu0 %v127_v38  ;;  %v494_v30 = vld [vmem:[%s1190_s3 + $0x8] sm:$0xff]  ;;  %v493_v31 = vld [vmem:[%s1190_s3] sm:$0xff]  ;;  %v606_v32 = vld [vmem:[%s1192_s5 + $0x78] sm:$0xff] }
  0x43   :  { %830 = vmatpush3.msra.mxu1 %v159_v39  ;;  %793 = vmatprep.subr.mxu0 %v142_v40  ;;  %v605_v33 = vld [vmem:[%s1192_s5 + $0x70] sm:$0xff]  ;;  %v604_v34 = vld [vmem:[%s1192_s5 + $0x68] sm:$0xff]  ;;  %v603_v35 = vld [vmem:[%s1192_s5 + $0x60] sm:$0xff] }
  0x44   :  { %831 = vmatprep.subr.mxu1 %v174_v41  ;;  %794 = vmatpush3.msra.mxu0 %v126_v42  ;;  %v602_v36 = vld [vmem:[%s1192_s5 + $0x58] sm:$0xff]  ;;  %v601_v37 = vld [vmem:[%s1192_s5 + $0x50] sm:$0xff]  ;;  %v600_v38 = vld [vmem:[%s1192_s5 + $0x48] sm:$0xff] }
  0x45   :  { %832 = vmatpush3.msra.mxu1 %v158_v43  ;;  %795 = vmatprep.subr.mxu0 %v141_v44  ;;  %v599_v39 = vld [vmem:[%s1192_s5 + $0x40] sm:$0xff]  ;;  %v598_v40 = vld [vmem:[%s1192_s5 + $0x38] sm:$0xff]  ;;  %v597_v41 = vld [vmem:[%s1192_s5 + $0x30] sm:$0xff] }
  0x46   :  { %833 = vmatprep.subr.mxu1 %v173_v45  ;;  %796 = vmatpush3.msra.mxu0 %v125_v46  ;;  %v596_v42 = vld [vmem:[%s1192_s5 + $0x28] sm:$0xff]  ;;  %v595_v43 = vld [vmem:[%s1192_s5 + $0x20] sm:$0xff]  ;;  %v594_v44 = vld [vmem:[%s1192_s5 + $0x18] sm:$0xff] }
  0x47   :  { %834 = vmatpush3.msra.mxu1 %v157_v47  ;;  %797 = vmatprep.subr.mxu0 %v140_v48 }
  0x48   :  { %835 = vmatprep.subr.mxu1 %v172_v49  ;;  %798 = vmatpush3.msra.mxu0 %v124_v50 }
  0x49   :  { %836 = vmatpush3.msra.mxu1 %v156_v51  ;;  %799 = vmatprep.subr.mxu0 %v139_v52  ;;  %v696_v52 = vld [vmem:[%s1189_s2] ss:$0 sm:$0xff] }
  0x4a   :  { %837 = vmatprep.subr.mxu1 %v171_v53  ;;  %260 = vmatprep.mubr.f32.mxu0 %v49_v54 }
  0x4b   :  { %800 = vmatpush3.msra.mxu0 %v123_v55  ;;  %838 = vmatpush3.msra.mxu1 %v155_v56 }
  0x4c   :  { %261 = vmatmul.mubr.f32.gmra.mxu0 %v48_v57  ;;  %801 = vmatprep.subr.mxu0 %v138_v58 }
  0x4d   :  { %839 = vmatprep.subr.mxu1 %v170_v59  ;;  %335 = vmatprep.mubr.f32.mxu1 %v51_v60 }
  0x4e   :  { %802 = vmatpush3.msra.mxu0 %v122_v61  ;;  %840 = vmatpush3.msra.mxu1 %v154_v62 }
  0x4f   :  { %803 = vmatprep.subr.mxu0 %v137_v63  ;;  %336 = vmatmul.mubr.f32.gmra.mxu1 %v50_v0 }
  0x50   :  { %841 = vmatprep.subr.mxu1 %v169_v1  ;;  %804 = vmatpush3.msra.mxu0 %v121_v2 }
  0x51   :  { %842 = vmatpush3.msra.mxu1 %v153_v3  ;;  %805 = vmatprep.subr.mxu0 %v136_v4 }
  0x52   :  { %843 = vmatprep.subr.mxu1 %v168_v5  ;;  %806 = vmatpush3.msra.mxu0 %v120_v6 }
  0x53   :  { %405 = vmatprep.mubr.f32.mxu0 %v45_v7  ;;  %844 = vmatpush3.msra.mxu1 %v152_v8 }
  0x54   :  { %480 = vmatprep.mubr.f32.mxu1 %v47_v9  ;;  %406 = vmatmul.mubr.f32.vlgmr.msra.gmra.mxu0 %v44_v10 }
  0x55   :  { %481 = vmatmul.mubr.f32.vlgmr.msra.gmra.mxu1 %v46_v11  ;;  %410 = vmatprep.mubr.f32.mxu0 %v53_v12 }
  0x56   :  { %485 = vmatprep.mubr.f32.mxu1 %v55_v13  ;;  %887 = vmatprep.subr.mxu0 %v508_v16 }
  0x57   :  { %888 = vmatpush3.msra.mxu0 %v508_v16  ;;  %922 = vmatprep.subr.mxu1 %v606_v32  ;;  %v593_v16 = vld [vmem:[%s1192_s5 + $0x10] sm:$0xff] }
  0x58   :  { %411 = vmatmul.mubr.f32.gmra.mxu0 %v52_v14  ;;  %889 = vmatprep.subr.mxu0 %v507_v17 }
  0x59   :  { %486 = vmatmul.mubr.f32.gmra.mxu1 %v54_v15  ;;  %890 = vmatpush3.msra.mxu0 %v507_v17  ;;  %v592_v17 = vld [vmem:[%s1192_s5 + $0x8] sm:$0xff] }
  0x5a   :  { %891 = vmatprep.subr.mxu0 %v506_v18  ;;  %923 = vmatpush3.msra.mxu1 %v606_v32 }
  0x5b   :  { %892 = vmatpush3.msra.mxu0 %v506_v18  ;;  %924 = vmatprep.subr.mxu1 %v605_v33  ;;  %v591_v18 = vld [vmem:[%s1192_s5] sm:$0xff] }
  0x5c   :  { %893 = vmatprep.subr.mxu0 %v505_v19  ;;  %925 = vmatpush3.msra.mxu1 %v605_v33 }
  0x5d   :  { %894 = vmatpush3.msra.mxu0 %v505_v19  ;;  %926 = vmatprep.subr.mxu1 %v604_v34 }
  0x5e   :  { %895 = vmatprep.subr.mxu0 %v504_v20  ;;  %927 = vmatpush3.msra.mxu1 %v604_v34 }
  0x5f   :  { %896 = vmatpush3.msra.mxu0 %v504_v20  ;;  %928 = vmatprep.subr.mxu1 %v603_v35  ;;  %v697_v20 = vld [vmem:[%s1191_s4] ss:$0 sm:$0xff] }
  0x60   :  { %897 = vmatprep.subr.mxu0 %v503_v21  ;;  %929 = vmatpush3.msra.mxu1 %v603_v35 }
  0x61   :  { %898 = vmatpush3.msra.mxu0 %v503_v21  ;;  %930 = vmatprep.subr.mxu1 %v602_v36 }
  0x62   :  { %899 = vmatprep.subr.mxu0 %v502_v22  ;;  %931 = vmatpush3.msra.mxu1 %v602_v36 }
  0x63   :  { %900 = vmatpush3.msra.mxu0 %v502_v22  ;;  %932 = vmatprep.subr.mxu1 %v601_v37 }
  0x64   :  { %901 = vmatprep.subr.mxu0 %v501_v23  ;;  %933 = vmatpush3.msra.mxu1 %v601_v37 }
  0x65   :  { %902 = vmatpush3.msra.mxu0 %v501_v23  ;;  %934 = vmatprep.subr.mxu1 %v600_v38 }
  0x66   :  { %903 = vmatprep.subr.mxu0 %v500_v24  ;;  %935 = vmatpush3.msra.mxu1 %v600_v38 }
  0x67   :  { %904 = vmatpush3.msra.mxu0 %v500_v24  ;;  %936 = vmatprep.subr.mxu1 %v599_v39  ;;  %v698_v24 = vld [vmem:[%s1193_s6] ss:$0 sm:$0xff] }
  0x68   :  { %905 = vmatprep.subr.mxu0 %v499_v25  ;;  %937 = vmatpush3.msra.mxu1 %v599_v39 }
  0x69   :  { %906 = vmatpush3.msra.mxu0 %v499_v25  ;;  %938 = vmatprep.subr.mxu1 %v598_v40 }
  0x6a   :  { %907 = vmatprep.subr.mxu0 %v498_v26  ;;  %939 = vmatpush3.msra.mxu1 %v598_v40 }
  0x6b   :  { %908 = vmatpush3.msra.mxu0 %v498_v26  ;;  %940 = vmatprep.subr.mxu1 %v597_v41 }
  0x6c   :  { %909 = vmatprep.subr.mxu0 %v497_v27  ;;  %941 = vmatpush3.msra.mxu1 %v597_v41 }
  0x6d   :  { %910 = vmatpush3.msra.mxu0 %v497_v27  ;;  %942 = vmatprep.subr.mxu1 %v596_v42 }
  0x6e   :  { %911 = vmatprep.subr.mxu0 %v496_v28  ;;  %943 = vmatpush3.msra.mxu1 %v596_v42 }
  0x6f   :  { %912 = vmatpush3.msra.mxu0 %v496_v28  ;;  %944 = vmatprep.subr.mxu1 %v595_v43 }
  0x70   :  { %913 = vmatprep.subr.mxu0 %v495_v29  ;;  %945 = vmatpush3.msra.mxu1 %v595_v43 }
  0x71   :  { %914 = vmatpush3.msra.mxu0 %v495_v29  ;;  %946 = vmatprep.subr.mxu1 %v594_v44 }
  0x72   :  { %915 = vmatprep.subr.mxu0 %v494_v30  ;;  %947 = vmatpush3.msra.mxu1 %v594_v44 }
  0x73   :  { %916 = vmatpush3.msra.mxu0 %v494_v30  ;;  %948 = vmatprep.subr.mxu1 %v593_v16 }
  0x74   :  { %917 = vmatprep.subr.mxu0 %v493_v31  ;;  %949 = vmatpush3.msra.mxu1 %v593_v16 }
  0x75   :  { %918 = vmatpush3.msra.mxu0 %v493_v31  ;;  %950 = vmatprep.subr.mxu1 %v592_v17 }
  0x76   :  { %951 = vmatpush3.msra.mxu1 %v592_v17 }
  0x77   :  { %952 = vmatprep.subr.mxu1 %v591_v18 }
  0x78   :  { %953 = vmatpush3.msra.mxu1 %v591_v18 }
  0xf0   :  { %v731_v45 = vpop.f32.mrf.mxu0 }
  0xf2   :  { %v769_v46 = vpop.f32.mrf.mxu1  ;;  %v732_v47 = vpop.f32.mrf.mxu0 }
  0xf3   :  { %v733_v50 = vadd.f32 %v732_v47, %v731_v45 }
  0xf4   :  { %v770_v49 = vpop.f32.mrf.mxu1 }
  0xf5   :  { %v258_v55 = vadd.f32 %v733_v50, %v696_v52  ;;  %v771_v56 = vadd.f32 %v770_v49, %v769_v46 }
  0xf7   :  { %v333_v62 = vadd.f32 %v771_v56, %v258_v55 }
 0x10c   :  { %v734_v48 = vpop.f32.mrf.mxu0 }
 0x10e   :  { %v735_v53 = vpop.f32.mrf.mxu0 }
 0x10f   :  { %v772_v51 = vpop.f32.mrf.mxu1  ;;  %v736_v57 = vadd.f32 %v735_v53, %v734_v48 }
 0x111   :  { %v773_v54 = vpop.f32.mrf.mxu1  ;;  %v263_v63 = vadd.f32 %v736_v57, %v696_v52 }
 0x112   :  { %v774_v0 = vadd.f32 %v773_v54, %v772_v51 }
 0x114   :  { %v807_v58 = vpop.f32.mrf.mxu0  ;;  %v338_v8 = vadd.f32 %v774_v0, %v263_v63 }
 0x115   :  { %v845_v59 = vpop.f32.mrf.mxu1 }
 0x116   :  { %v808_v60 = vpop.f32.mrf.mxu0 }
 0x117   :  { %v846_v61 = vpop.f32.mrf.mxu1  ;;  %v809_v1 = vadd.f32 %v808_v60, %v807_v58 }
 0x118   :  { %v810_v2 = vpop.f32.mrf.mxu0  ;;  %v847_v5 = vadd.f32 %v846_v61, %v845_v59 }
 0x119   :  { %v848_v3 = vpop.f32.mrf.mxu1  ;;  %v408_v4 = vadd.f32 %v809_v1, %v333_v62 }
 0x11a   :  { %v811_v6 = vpop.f32.mrf.mxu0 }
 0x11b   :  { %v849_v7 = vpop.f32.mrf.mxu1  ;;  %v483_v9 = vadd.f32 %v847_v5, %v408_v4  ;;  %v812_v10 = vadd.f32 %v811_v6, %v810_v2 }
 0x11c   :  { %v850_v13 = vadd.f32 %v849_v7, %v848_v3 }
 0x11d   :  { %v491_v11 = vmax.f32 %v483_v9, 0.0  ;;  %v413_v12 = vadd.f32 %v812_v10, %v338_v8 }
 0x11f   :  { %v488_v14 = vadd.f32 %v850_v13, %v413_v12  ;;  %919 = vmatprep.mubr.f32.mxu0 %v491_v11 }
 0x121   :  { %v492_v15 = vmax.f32 %v488_v14, 0.0 }
 0x123   :  { %920 = vmatmul.mubr.f32.vlgmr.msra.gmra.mxu0 %v492_v15 }
 0x1e3   :  { %v921_v19 = vpop.f32.mrf.mxu0 }
 0x1e4   :  { %v588_v23 = vadd.f32 %v921_v19, %v697_v20 }
 0x1e5   :  { %v582_v21 = vpop.f32.mrf.mxu0 }
 0x1e6   :  { %v583_v22 = vadd.f32 %v697_v20, %v582_v21 }
 0x1e8   :  { %954 = vmatprep.mubr.f32.mxu1 %v583_v22 }
 0x1e9   :  { %955 = vmatmul.mubr.f32.vlgmr.msra.gmra.mxu1 %v588_v23 }
 0x2a9   :  { %v956_v25 = vpop.f32.mrf.mxu1 }
 0x2aa   :  { %v686_v26 = vadd.f32 %v956_v25, %v698_v24 }
 0x2ab   :  { %v680_v27 = vpop.f32.mrf.mxu1 }
 0x2ac   :  { %690 = vst [vmem:[%s1194_s7 + $0x8] sm:$0xff] %v686_v26  ;;  %v681_v28 = vadd.f32 %v698_v24, %v680_v27 }
 0x2ae   :  { %689 = vst [vmem:[%s1194_s7] sm:$0xff] %v681_v28 }
 0x2af   :  { %695 = vsyncpa [#allocation3], 1 }

</bundles_post_ra>
